<compile_context>
chip_gen: v7x
topology: tpu7x:2x2x1
jax: 0.10.0
libtpu: 0.0.40
codegen_flags: <defaults>
</compile_context>

<pallas_src>
import functools

import jax
import jax.numpy as jnp
import numpy as np
from jax.experimental import pallas as pl
from jax.experimental.pallas import tpu as pltpu

_LANE = 128                     # TPU lane width
_STATS_TL = 2048                # lane-stripe width for the stats reduction
_APPLY_BYTES = 512 * 1024       # ~0.5 MiB per apply stripe buffer (per review)


def _round_up(n, m):
    return ((n + m - 1) // m) * m


# --------------------------- Pallas kernels ---------------------------------
def _stats_kernel(xs_ref, deconv_ref, bias_ref, sum_acc, cov_acc, *,
                  inv_ns, eps, n_iter, blk):
    """Tiled row-sum + covariance accumulation; Newton–Schulz isqrt on the last step."""
    s = pl.program_id(0)

    @pl.when(s == 0)
    def _():
        sum_acc[...] = jnp.zeros_like(sum_acc)
        cov_acc[...] = jnp.zeros_like(cov_acc)

    xs = xs_ref[...]                                         # (B, TS), zero padded
    sum_acc[...] += jnp.sum(xs, axis=1, keepdims=True)
    cov_acc[...] += jnp.dot(xs, xs.T, preferred_element_type=jnp.float32)

    @pl.when(s == pl.num_programs(0) - 1)
    def _():
        mean1 = sum_acc[...] * inv_ns                        # (B, 1)
        eye = (jax.lax.broadcasted_iota(jnp.int32, (blk, blk), 0) ==
               jax.lax.broadcasted_iota(jnp.int32, (blk, blk), 1)).astype(jnp.float32)
        # covariance of the UNcentered sub-sample (matches PyTorch, which slices x1_s
        # before rebinding x1 = x1 - mean1).  Zero padding adds nothing.
        cov = cov_acc[...] * inv_ns + eps * eye

        # Newton–Schulz iteration for cov^{-1/2}
        norm_a = jnp.sqrt(jnp.sum(cov * cov, keepdims=True))  # (1,1) Frobenius norm
        y = cov / norm_a
        z = eye
        for _ in range(n_iter):                               # small & static -> unrolled
            t = 1.5 * eye - 0.5 * jnp.dot(z, y, preferred_element_type=jnp.float32)
            y = jnp.dot(y, t, preferred_element_type=jnp.float32)
            z = jnp.dot(t, z, preferred_element_type=jnp.float32)
        deconv = z / jnp.sqrt(norm_a)

        deconv_ref[...] = deconv
        # fold the mean subtraction into a bias: deconv @ (x - mean) = deconv @ x - bias
        bias_ref[...] = jnp.dot(deconv, mean1, preferred_element_type=jnp.float32)


def _apply_kernel(deconv_ref, bias_ref, x_ref, out_ref):
    """One (sample, lane-stripe): out = deconv @ x - deconv @ mean."""
    out_ref[...] = (jnp.dot(deconv_ref[...], x_ref[...],
                            preferred_element_type=jnp.float32)
                    - bias_ref[...])


# ------------------------------ wrapper --------------------------------------
def channel_deconv(x, *, block, eps=0.01, n_iter=5, sampling_stride=3):
    """Training-mode ChannelDeconv forward. x: (N, C, H, W) or (N, C) float32."""
    x_shape = x.shape
    if x.ndim == 2:
        x = x.reshape(x.shape[0], x.shape[1], 1, 1)
    x = x.astype(jnp.float32)
    N, C, H, W = x.shape
    B = int(block)
    G = C // B
    c = G * B
    assert c > 0, "block must be <= number of channels"
    HW = H * W
    M = G * HW                      # lane length per (sample, channel-block row)
    L = N * M                       # columns of the PyTorch (B, L) x1 matrix
    step = sampling_stride ** 2
    use_sub = sampling_stride > 1 and H >= sampling_stride and W >= sampling_stride

    # Free contiguous view of the head channels: x_head[n, b, g*HW + p] = x[n, b*G+g, p].
    x_head = x[:, :c].reshape(N, B, M)

    # ---- exact sub-sample element set (no transpose / no x1 materialization) ----
    # PyTorch picks x1[b, j*step] with flat idx over (g, n, h, w).  mean/cov are
    # permutation-invariant over columns, so gather exactly that element set directly
    # from the native layout.
    if use_sub:
        n_s = (L + step - 1) // step
        flat = jnp.arange(n_s, dtype=jnp.int32) * step
    else:
        n_s = L
        flat = jnp.arange(n_s, dtype=jnp.int32)
    g_idx = flat // (N * HW)
    rem = flat % (N * HW)
    n_idx = rem // HW
    p_idx = rem % HW
    x_flat = x[:, :c].reshape(N, c, HW)
    b_col = jnp.arange(B, dtype=jnp.int32)[:, None]
    x1_s = x_flat[n_idx[None, :], b_col * G + g_idx[None, :], p_idx[None, :]]  # (B, n_s)

    # ---- Pallas kernel 1: tiled stats + Newton–Schulz isqrt --------------------
    ts = min(_STATS_TL, _round_up(n_s, _LANE))
    ls_pad = _round_up(n_s, ts)
    x1_s = jnp.pad(x1_s, ((0, 0), (0, ls_pad - n_s)))        # small: 1/stride^2 of head
    deconv, bias = pl.pallas_call(
        functools.partial(_stats_kernel, inv_ns=1.0 / n_s, eps=float(eps),
                          n_iter=int(n_iter), blk=B),
        out_shape=(jax.ShapeDtypeStruct((B, B), jnp.float32),
                   jax.ShapeDtypeStruct((B, 1), jnp.float32)),
        grid=(ls_pad // ts,),
        in_specs=[pl.BlockSpec((B, ts), lambda s: (0, s))],
        out_specs=(pl.BlockSpec((B, B), lambda s: (0, 0)),
                   pl.BlockSpec((B, 1), lambda s: (0, 0))),
        scratch_shapes=[pltpu.VMEM((B, 1), jnp.float32),
                        pltpu.VMEM((B, B), jnp.float32)],
        compiler_params=pltpu.CompilerParams(
            dimension_semantics=("arbitrary",)),
    )(x1_s)

    # ---- Pallas kernel 2: whitening, streamed over (N, lane-stripes) -----------
    # Stripe sized for ~0.5 MiB per buffer; ragged last stripe handled by Pallas
    # OOB masking (no full-array pad copy).
    if M >= _LANE:
        tl = min(_round_up(M, _LANE),
                 _round_up(max(_APPLY_BYTES // 4 // B, _LANE), _LANE))
    else:
        tl = M                                              # tiny spatial extent
    n_stripes = pl.cdiv(M, tl)

    out_head = pl.pallas_call(
        _apply_kernel,
        out_shape=jax.ShapeDtypeStruct((N, B, M), jnp.float32),
        grid=(N, n_stripes),
        in_specs=[pl.BlockSpec((B, B), lambda n, s: (0, 0)),
                  pl.BlockSpec((B, 1), lambda n, s: (0, 0)),
                  pl.BlockSpec((None, B, tl), lambda n, s: (n, 0, s))],
        out_specs=pl.BlockSpec((None, B, tl), lambda n, s: (n, 0, s)),
        compiler_params=pltpu.CompilerParams(
            dimension_semantics=("parallel", "parallel")),
    )(deconv, bias, x_head)

    out1 = out_head.reshape(N, c, H, W)                      # free: channel = b*G + g

    # ---- remainder channels (C not divisible by block): scalar standardize -----
    if c != C:
        # TODO(synk): remainder-channel standardization kept as plain-JAX glue
        # (two scalar reductions + one elementwise pass), not a Pallas kernel.
        x_rest = x[:, c:]
        x_tmp = x_rest.reshape(N, -1)
        x_s = x_tmp[:, ::step] if use_sub else x_tmp
        mean2 = jnp.mean(x_s)
        var2 = jnp.var(x_s, ddof=1)                          # torch unbiased var
        x_rest = (x_rest - mean2) / jnp.sqrt(var2 + eps)
        out = jnp.concatenate([out1, x_rest], axis=1)
    else:
        out = out1

    if len(x_shape) == 2:
        out = out.reshape(x_shape)
    return out


# ----------------------- pure-numpy reference --------------------------------
def _isqrt_newton_schulz_ref(A, num_iters):
    dim = A.shape[0]
    normA = np.linalg.norm(A)                                # Frobenius
    Y = A / normA
    I = np.eye(dim, dtype=A.dtype)
    Z = np.eye(dim, dtype=A.dtype)
    for _ in range(num_iters):
        T = 0.5 * (3.0 * I - Z @ Y)
        Y = Y @ T
        Z = T @ Z
    return Z / np.sqrt(normA)


def channel_deconv_ref(x, *, block, eps=0.01, n_iter=5, sampling_stride=3):
    x = np.asarray(x, dtype=np.float32)
    N, C, H, W = x.shape
    B = block
    c = (C // B) * B
    x1 = np.transpose(x[:, :c], (1, 0, 2, 3)).reshape(B, -1)
    use_sub = sampling_stride > 1 and H >= sampling_stride and W >= sampling_stride
    x1_s = x1[:, ::sampling_stride ** 2] if use_sub else x1
    mean1 = x1_s.mean(-1, keepdims=True)
    x1c = x1 - mean1
    cov = x1_s @ x1_s.T / x1_s.shape[1] + eps * np.eye(B, dtype=np.float32)
    deconv = _isqrt_newton_schulz_ref(cov, n_iter)
    out = (deconv @ x1c).reshape(c, N, H, W).transpose(1, 0, 2, 3)
    if c != C:
        x_tmp = x[:, c:].reshape(N, -1)
        x_s = x_tmp[:, ::sampling_stride ** 2] if use_sub else x_tmp
        mean2 = x_s.mean()
        var2 = x_s.var(ddof=1)
        x_rest = (x[:, c:] - mean2) / np.sqrt(var2 + eps)
        out = np.concatenate([out, x_rest], axis=1)
    return out


if __name__ == "__main__":
    key = jax.random.PRNGKey(0)
    k1, k2 = jax.random.split(key)

    # Config A: channels divisible by block (pure Pallas path).
    x_a = jax.random.normal(k1, (2, 8, 16, 16), jnp.float32)
    fwd_a = jax.jit(functools.partial(channel_deconv, block=4))
    out_a = jax.block_until_ready(fwd_a(x_a))
    assert out_a.shape == (2, 8, 16, 16)
    ref_a = channel_deconv_ref(np.asarray(x_a), block=4)
    np.testing.assert_allclose(np.asarray(out_a), ref_a, atol=5e-2, rtol=5e-2)

    # Config B: channels NOT divisible by block (exercises the remainder branch).
    x_b = jax.random.normal(k2, (2, 6, 16, 16), jnp.float32)
    fwd_b = jax.jit(functools.partial(channel_deconv, block=4))
    out_b = jax.block_until_ready(fwd_b(x_b))
    assert out_b.shape == (2, 6, 16, 16)
    ref_b = channel_deconv_ref(np.asarray(x_b), block=4)
    np.testing.assert_allclose(np.asarray(out_b), ref_b, atol=5e-2, rtol=5e-2)

    print("KERNEL_OK")
</pallas_src>

<mosaic_0001>
module attributes {stable_mosaic.version = 11 : i64} {
  func.func @_stats_kernel(%arg0: i32, %arg1: memref<4x128xf32, #tpu.memory_space<vmem>>, %arg2: memref<4x4xf32, #tpu.memory_space<vmem>>, %arg3: memref<4x1xf32, #tpu.memory_space<vmem>>, %arg4: memref<4x1xf32, #tpu.memory_space<vmem>>, %arg5: memref<4x4xf32, #tpu.memory_space<vmem>>) attributes {dimension_semantics = [#tpu.dimension_semantics<arbitrary>], iteration_bounds = array<i64: 1>, scalar_prefetch = 0 : i64, scratch_operands = 2 : i64, tpu.core_type = #tpu.core_type<tc>, window_params = [{transform_indices = @transform_0, window_bounds = array<i64: 4, 128>}, {pipeline_mode = #tpu.pipeline_mode<synchronous>, transform_indices = @transform_1, window_bounds = array<i64: 4, 4>}, {pipeline_mode = #tpu.pipeline_mode<synchronous>, transform_indices = @transform_2, window_bounds = array<i64: 4, 1>}]} {
    %c0_i32 = arith.constant 0 : i32
    %0 = arith.cmpi eq, %arg0, %c0_i32 : i32
    %1 = arith.extui %0 : i1 to i32
    %c0_i32_0 = arith.constant 0 : i32
    %2 = arith.cmpi ne, %1, %c0_i32_0 : i32
    scf.if %2 {
      %cst_13 = arith.constant 0.000000e+00 : f32
      %17 = vector.broadcast %cst_13 : f32 to vector<4x1xf32>
      %c0_14 = arith.constant 0 : index
      %c0_15 = arith.constant 0 : index
      %18 = vector.load %arg4[%c0_14, %c0_15] : memref<4x1xf32, #tpu.memory_space<vmem>>, vector<4x1xf32>
      tpu.vector_store %arg4[%c0_14, %c0_15], %17 {strides = array<i32>} : memref<4x1xf32, #tpu.memory_space<vmem>>, vector<4x1xf32>,
      %cst_16 = arith.constant 0.000000e+00 : f32
      %19 = vector.broadcast %cst_16 : f32 to vector<4x4xf32>
      %c0_17 = arith.constant 0 : index
      %c0_18 = arith.constant 0 : index
      %20 = vector.load %arg5[%c0_17, %c0_18] : memref<4x4xf32, #tpu.memory_space<vmem>>, vector<4x4xf32>
      tpu.vector_store %arg5[%c0_17, %c0_18], %19 {strides = array<i32>} : memref<4x4xf32, #tpu.memory_space<vmem>>, vector<4x4xf32>,
    } else {
    }
    %c0 = arith.constant 0 : index
    %c0_1 = arith.constant 0 : index
    %3 = vector.load %arg1[%c0, %c0_1] : memref<4x128xf32, #tpu.memory_space<vmem>>, vector<4x128xf32>
    %c0_2 = arith.constant 0 : index
    %c0_3 = arith.constant 0 : index
    %4 = vector.load %arg4[%c0_2, %c0_3] : memref<4x1xf32, #tpu.memory_space<vmem>>, vector<4x1xf32>
    %cst = arith.constant dense<0.000000e+00> : vector<4xf32>
    %5 = vector.multi_reduction <add>, %3, %cst [1] : vector<4x128xf32> to vector<4xf32>
    %6 = vector.shape_cast %5 : vector<4xf32> to vector<4x1xf32>
    %7 = arith.addf %4, %6 : vector<4x1xf32>
    %c0_4 = arith.constant 0 : index
    %c0_5 = arith.constant 0 : index
    %8 = vector.load %arg4[%c0_4, %c0_5] : memref<4x1xf32, #tpu.memory_space<vmem>>, vector<4x1xf32>
    tpu.vector_store %arg4[%c0_4, %c0_5], %7 {strides = array<i32>} : memref<4x1xf32, #tpu.memory_space<vmem>>, vector<4x1xf32>,
    %c0_6 = arith.constant 0 : index
    %c0_7 = arith.constant 0 : index
    %9 = vector.load %arg5[%c0_6, %c0_7] : memref<4x4xf32, #tpu.memory_space<vmem>>, vector<4x4xf32>
    %10 = tpu.transpose %3, [1, 0] : vector<4x128xf32> -> vector<128x4xf32>
    %cst_8 = arith.constant dense<0.000000e+00> : vector<4x4xf32>
    %11 = tpu.matmul %3, %10, %cst_8 {dimension_numbers = #tpu.dot_dimension_numbers<[1], [0], [0], [1], [0, 0, 1, 1], [], []>} : vector<4x128xf32>, vector<128x4xf32>, vector<4x4xf32> -> vector<4x4xf32>
    %12 = arith.addf %9, %11 : vector<4x4xf32>
    %c0_9 = arith.constant 0 : index
    %c0_10 = arith.constant 0 : index
    %13 = vector.load %arg5[%c0_9, %c0_10] : memref<4x4xf32, #tpu.memory_space<vmem>>, vector<4x4xf32>
    tpu.vector_store %arg5[%c0_9, %c0_10], %12 {strides = array<i32>} : memref<4x4xf32, #tpu.memory_space<vmem>>, vector<4x4xf32>,
    %c0_i32_11 = arith.constant 0 : i32
    %14 = arith.cmpi eq, %arg0, %c0_i32_11 : i32
    %15 = arith.extui %14 : i1 to i32
    %c0_i32_12 = arith.constant 0 : i32
    %16 = arith.cmpi ne, %15, %c0_i32_12 : i32
    scf.if %16 {
      %c0_13 = arith.constant 0 : index
      %c0_14 = arith.constant 0 : index
      %17 = vector.load %arg4[%c0_13, %c0_14] : memref<4x1xf32, #tpu.memory_space<vmem>>, vector<4x1xf32>
      %cst_15 = arith.constant 0.00877192988 : f32
      %18 = vector.broadcast %cst_15 : f32 to vector<4x1xf32>
      %19 = arith.mulf %17, %18 : vector<4x1xf32>
      %20 = tpu.iota {dimensions = array<i32: 0>} : vector<4x4xi32>
      %21 = tpu.iota {dimensions = array<i32: 1>} : vector<4x4xi32>
      %22 = arith.cmpi eq, %20, %21 : vector<4x4xi32>
      %23 = arith.extui %22 : vector<4x4xi1> to vector<4x4xi32>
      %24 = arith.sitofp %23 : vector<4x4xi32> to vector<4x4xf32>
      %c0_16 = arith.constant 0 : index
      %c0_17 = arith.constant 0 : index
      %25 = vector.load %arg5[%c0_16, %c0_17] : memref<4x4xf32, #tpu.memory_space<vmem>>, vector<4x4xf32>
      %cst_18 = arith.constant 0.00877192988 : f32
      %26 = vector.broadcast %cst_18 : f32 to vector<4x4xf32>
      %27 = arith.mulf %25, %26 : vector<4x4xf32>
      %cst_19 = arith.constant 0.00999999977 : f32
      %28 = vector.broadcast %cst_19 : f32 to vector<4x4xf32>
      %29 = arith.mulf %28, %24 : vector<4x4xf32>
      %30 = arith.addf %27, %29 : vector<4x4xf32>
      %31 = arith.mulf %30, %30 : vector<4x4xf32>
      %32 = vector.shape_cast %31 : vector<4x4xf32> to vector<1x4x4xf32>
      %cst_20 = arith.constant dense<0.000000e+00> : vector<1xf32>
      %33 = vector.multi_reduction <add>, %32, %cst_20 [1, 2] : vector<1x4x4xf32> to vector<1xf32>
      %34 = vector.shape_cast %33 : vector<1xf32> to vector<1x1x1xf32>
      %35 = vector.extract %34[0, 0, 0] : f32 from vector<1x1x1xf32>
      %36 = vector.broadcast %35 : f32 to vector<1x1xf32>
      %37 = math.sqrt %36 : vector<1x1xf32>
      %38 = vector.broadcast %37 : vector<1x1xf32> to vector<4x4xf32>
      %39 = arith.divf %30, %38 : vector<4x4xf32>
      %cst_21 = arith.constant 1.500000e+00 : f32
      %40 = vector.broadcast %cst_21 : f32 to vector<4x4xf32>
      %41 = arith.mulf %40, %24 : vector<4x4xf32>
      %cst_22 = arith.constant dense<0.000000e+00> : vector<4x4xf32>
      %42 = tpu.matmul %24, %39, %cst_22 {dimension_numbers = #tpu.dot_dimension_numbers<[1], [0], [0], [1], [0, 0, 1, 1], [], []>} : vector<4x4xf32>, vector<4x4xf32>, vector<4x4xf32> -> vector<4x4xf32>
      %cst_23 = arith.constant 5.000000e-01 : f32
      %43 = vector.broadcast %cst_23 : f32 to vector<4x4xf32>
      %44 = arith.mulf %43, %42 : vector<4x4xf32>
      %45 = arith.subf %41, %44 : vector<4x4xf32>
      %cst_24 = arith.constant dense<0.000000e+00> : vector<4x4xf32>
      %46 = tpu.matmul %39, %45, %cst_24 {dimension_numbers = #tpu.dot_dimension_numbers<[1], [0], [0], [1], [0, 0, 1, 1], [], []>} : vector<4x4xf32>, vector<4x4xf32>, vector<4x4xf32> -> vector<4x4xf32>
      %cst_25 = arith.constant dense<0.000000e+00> : vector<4x4xf32>
      %47 = tpu.matmul %45, %24, %cst_25 {dimension_numbers = #tpu.dot_dimension_numbers<[1], [0], [0], [1], [0, 0, 1, 1], [], []>} : vector<4x4xf32>, vector<4x4xf32>, vector<4x4xf32> -> vector<4x4xf32>
      %cst_26 = arith.constant 1.500000e+00 : f32
      %48 = vector.broadcast %cst_26 : f32 to vector<4x4xf32>
      %49 = arith.mulf %48, %24 : vector<4x4xf32>
      %cst_27 = arith.constant dense<0.000000e+00> : vector<4x4xf32>
      %50 = tpu.matmul %47, %46, %cst_27 {dimension_numbers = #tpu.dot_dimension_numbers<[1], [0], [0], [1], [0, 0, 1, 1], [], []>} : vector<4x4xf32>, vector<4x4xf32>, vector<4x4xf32> -> vector<4x4xf32>
      %cst_28 = arith.constant 5.000000e-01 : f32
      %51 = vector.broadcast %cst_28 : f32 to vector<4x4xf32>
      %52 = arith.mulf %51, %50 : vector<4x4xf32>
      %53 = arith.subf %49, %52 : vector<4x4xf32>
      %cst_29 = arith.constant dense<0.000000e+00> : vector<4x4xf32>
      %54 = tpu.matmul %46, %53, %cst_29 {dimension_numbers = #tpu.dot_dimension_numbers<[1], [0], [0], [1], [0, 0, 1, 1], [], []>} : vector<4x4xf32>, vector<4x4xf32>, vector<4x4xf32> -> vector<4x4xf32>
      %cst_30 = arith.constant dense<0.000000e+00> : vector<4x4xf32>
      %55 = tpu.matmul %53, %47, %cst_30 {dimension_numbers = #tpu.dot_dimension_numbers<[1], [0], [0], [1], [0, 0, 1, 1], [], []>} : vector<4x4xf32>, vector<4x4xf32>, vector<4x4xf32> -> vector<4x4xf32>
      %cst_31 = arith.constant 1.500000e+00 : f32
      %56 = vector.broadcast %cst_31 : f32 to vector<4x4xf32>
      %57 = arith.mulf %56, %24 : vector<4x4xf32>
      %cst_32 = arith.constant dense<0.000000e+00> : vector<4x4xf32>
      %58 = tpu.matmul %55, %54, %cst_32 {dimension_numbers = #tpu.dot_dimension_numbers<[1], [0], [0], [1], [0, 0, 1, 1], [], []>} : vector<4x4xf32>, vector<4x4xf32>, vector<4x4xf32> -> vector<4x4xf32>
      %cst_33 = arith.constant 5.000000e-01 : f32
      %59 = vector.broadcast %cst_33 : f32 to vector<4x4xf32>
      %60 = arith.mulf %59, %58 : vector<4x4xf32>
      %61 = arith.subf %57, %60 : vector<4x4xf32>
      %cst_34 = arith.constant dense<0.000000e+00> : vector<4x4xf32>
      %62 = tpu.matmul %54, %61, %cst_34 {dimension_numbers = #tpu.dot_dimension_numbers<[1], [0], [0], [1], [0, 0, 1, 1], [], []>} : vector<4x4xf32>, vector<4x4xf32>, vector<4x4xf32> -> vector<4x4xf32>
      %cst_35 = arith.constant dense<0.000000e+00> : vector<4x4xf32>
      %63 = tpu.matmul %61, %55, %cst_35 {dimension_numbers = #tpu.dot_dimension_numbers<[1], [0], [0], [1], [0, 0, 1, 1], [], []>} : vector<4x4xf32>, vector<4x4xf32>, vector<4x4xf32> -> vector<4x4xf32>
      %cst_36 = arith.constant 1.500000e+00 : f32
      %64 = vector.broadcast %cst_36 : f32 to vector<4x4xf32>
      %65 = arith.mulf %64, %24 : vector<4x4xf32>
      %cst_37 = arith.constant dense<0.000000e+00> : vector<4x4xf32>
      %66 = tpu.matmul %63, %62, %cst_37 {dimension_numbers = #tpu.dot_dimension_numbers<[1], [0], [0], [1], [0, 0, 1, 1], [], []>} : vector<4x4xf32>, vector<4x4xf32>, vector<4x4xf32> -> vector<4x4xf32>
      %cst_38 = arith.constant 5.000000e-01 : f32
      %67 = vector.broadcast %cst_38 : f32 to vector<4x4xf32>
      %68 = arith.mulf %67, %66 : vector<4x4xf32>
      %69 = arith.subf %65, %68 : vector<4x4xf32>
      %cst_39 = arith.constant dense<0.000000e+00> : vector<4x4xf32>
      %70 = tpu.matmul %62, %69, %cst_39 {dimension_numbers = #tpu.dot_dimension_numbers<[1], [0], [0], [1], [0, 0, 1, 1], [], []>} : vector<4x4xf32>, vector<4x4xf32>, vector<4x4xf32> -> vector<4x4xf32>
      %cst_40 = arith.constant dense<0.000000e+00> : vector<4x4xf32>
      %71 = tpu.matmul %69, %63, %cst_40 {dimension_numbers = #tpu.dot_dimension_numbers<[1], [0], [0], [1], [0, 0, 1, 1], [], []>} : vector<4x4xf32>, vector<4x4xf32>, vector<4x4xf32> -> vector<4x4xf32>
      %cst_41 = arith.constant 1.500000e+00 : f32
      %72 = vector.broadcast %cst_41 : f32 to vector<4x4xf32>
      %73 = arith.mulf %72, %24 : vector<4x4xf32>
      %cst_42 = arith.constant dense<0.000000e+00> : vector<4x4xf32>
      %74 = tpu.matmul %71, %70, %cst_42 {dimension_numbers = #tpu.dot_dimension_numbers<[1], [0], [0], [1], [0, 0, 1, 1], [], []>} : vector<4x4xf32>, vector<4x4xf32>, vector<4x4xf32> -> vector<4x4xf32>
      %cst_43 = arith.constant 5.000000e-01 : f32
      %75 = vector.broadcast %cst_43 : f32 to vector<4x4xf32>
      %76 = arith.mulf %75, %74 : vector<4x4xf32>
      %77 = arith.subf %73, %76 : vector<4x4xf32>
      %cst_44 = arith.constant dense<0.000000e+00> : vector<4x4xf32>
      %78 = tpu.matmul %77, %71, %cst_44 {dimension_numbers = #tpu.dot_dimension_numbers<[1], [0], [0], [1], [0, 0, 1, 1], [], []>} : vector<4x4xf32>, vector<4x4xf32>, vector<4x4xf32> -> vector<4x4xf32>
      %79 = math.sqrt %37 : vector<1x1xf32>
      %80 = vector.broadcast %79 : vector<1x1xf32> to vector<4x4xf32>
      %81 = arith.divf %78, %80 : vector<4x4xf32>
      %c0_45 = arith.constant 0 : index
      %c0_46 = arith.constant 0 : index
      %82 = vector.load %arg2[%c0_45, %c0_46] : memref<4x4xf32, #tpu.memory_space<vmem>>, vector<4x4xf32>
      tpu.vector_store %arg2[%c0_45, %c0_46], %81 {strides = array<i32>} : memref<4x4xf32, #tpu.memory_space<vmem>>, vector<4x4xf32>,
      %cst_47 = arith.constant dense<0.000000e+00> : vector<4x1xf32>
      %83 = tpu.matmul %81, %19, %cst_47 {dimension_numbers = #tpu.dot_dimension_numbers<[1], [0], [0], [1], [0, 0, 1, 1], [], []>} : vector<4x4xf32>, vector<4x1xf32>, vector<4x1xf32> -> vector<4x1xf32>
      %c0_48 = arith.constant 0 : index
      %c0_49 = arith.constant 0 : index
      %84 = vector.load %arg3[%c0_48, %c0_49] : memref<4x1xf32, #tpu.memory_space<vmem>>, vector<4x1xf32>
      tpu.vector_store %arg3[%c0_48, %c0_49], %83 {strides = array<i32>} : memref<4x1xf32, #tpu.memory_space<vmem>>, vector<4x1xf32>,
    } else {
    }
    return
  }
  func.func @transform_0(%arg0: i32) -> (i32, i32) {
    %c0_i32 = arith.constant 0 : i32
    %c0_i32_0 = arith.constant 0 : i32
    return %c0_i32, %arg0 : i32, i32
  }
  func.func @transform_1(%arg0: i32) -> (i32, i32) {
    %c0_i32 = arith.constant 0 : i32
    %c0_i32_0 = arith.constant 0 : i32
    %c0_i32_1 = arith.constant 0 : i32
    return %c0_i32, %c0_i32_0 : i32, i32
  }
  func.func @transform_2(%arg0: i32) -> (i32, i32) {
    %c0_i32 = arith.constant 0 : i32
    %c0_i32_0 = arith.constant 0 : i32
    %c0_i32_1 = arith.constant 0 : i32
    return %c0_i32, %c0_i32_0 : i32, i32
  }
}

module attributes {stable_mosaic.version = 11 : i64} {
  func.func @_apply_kernel(%arg0: i32, %arg1: i32, %arg2: memref<4x4xf32, #tpu.memory_space<vmem>>, %arg3: memref<4x1xf32, #tpu.memory_space<vmem>>, %arg4: memref<1x4x512xf32, #tpu.memory_space<vmem>>, %arg5: memref<1x4x512xf32, #tpu.memory_space<vmem>>) attributes {dimension_semantics = [#tpu.dimension_semantics<parallel>, #tpu.dimension_semantics<parallel>], iteration_bounds = array<i64: 2, 1>, scalar_prefetch = 0 : i64, scratch_operands = 0 : i64, tpu.core_type = #tpu.core_type<tc>, window_params = [{pipeline_mode = #tpu.pipeline_mode<synchronous>, transform_indices = @transform_0, window_bounds = array<i64: 4, 4>}, {pipeline_mode = #tpu.pipeline_mode<synchronous>, transform_indices = @transform_1, window_bounds = array<i64: 4, 1>}, {transform_indices = @transform_2, window_bounds = array<i64: 1, 4, 512>}, {transform_indices = @transform_3, window_bounds = array<i64: 1, 4, 512>}]} {
    %c0 = arith.constant 0 : index
    %c0_0 = arith.constant 0 : index
    %0 = vector.load %arg2[%c0, %c0_0] : memref<4x4xf32, #tpu.memory_space<vmem>>, vector<4x4xf32>
    %c0_1 = arith.constant 0 : index
    %c0_2 = arith.constant 0 : index
    %c0_3 = arith.constant 0 : index
    %1 = vector.load %arg4[%c0_1, %c0_2, %c0_3] : memref<1x4x512xf32, #tpu.memory_space<vmem>>, vector<1x4x512xf32>
    %2 = vector.shape_cast %1 : vector<1x4x512xf32> to vector<4x512xf32>
    %cst = arith.constant dense<0.000000e+00> : vector<4x512xf32>
    %3 = tpu.matmul %0, %2, %cst {dimension_numbers = #tpu.dot_dimension_numbers<[1], [0], [0], [1], [0, 0, 1, 1], [], []>} : vector<4x4xf32>, vector<4x512xf32>, vector<4x512xf32> -> vector<4x512xf32>
    %c0_4 = arith.constant 0 : index
    %c0_5 = arith.constant 0 : index
    %4 = vector.load %arg3[%c0_4, %c0_5] : memref<4x1xf32, #tpu.memory_space<vmem>>, vector<4x1xf32>
    %5 = vector.broadcast %4 : vector<4x1xf32> to vector<4x512xf32>
    %6 = arith.subf %3, %5 : vector<4x512xf32>
    %c0_6 = arith.constant 0 : index
    %c0_7 = arith.constant 0 : index
    %c0_8 = arith.constant 0 : index
    %7 = vector.load %arg5[%c0_6, %c0_7, %c0_8] : memref<1x4x512xf32, #tpu.memory_space<vmem>>, vector<1x4x512xf32>
    %8 = vector.shape_cast %7 : vector<1x4x512xf32> to vector<4x512xf32>
    %9 = vector.shape_cast %6 : vector<4x512xf32> to vector<1x4x512xf32>
    tpu.vector_store %arg5[%c0_6, %c0_7, %c0_8], %9 {strides = array<i32>} : memref<1x4x512xf32, #tpu.memory_space<vmem>>, vector<1x4x512xf32>,
    return
  }
  func.func @transform_0(%arg0: i32, %arg1: i32) -> (i32, i32) {
    %c0_i32 = arith.constant 0 : i32
    %c0_i32_0 = arith.constant 0 : i32
    %c0_i32_1 = arith.constant 0 : i32
    return %c0_i32, %c0_i32_0 : i32, i32
  }
  func.func @transform_1(%arg0: i32, %arg1: i32) -> (i32, i32) {
    %c0_i32 = arith.constant 0 : i32
    %c0_i32_0 = arith.constant 0 : i32
    %c0_i32_1 = arith.constant 0 : i32
    return %c0_i32, %c0_i32_0 : i32, i32
  }
  func.func @transform_2(%arg0: i32, %arg1: i32) -> (i32, i32, i32) {
    %c0_i32 = arith.constant 0 : i32
    %c0_i32_0 = arith.constant 0 : i32
    return %arg0, %c0_i32, %arg1 : i32, i32, i32
  }
  func.func @transform_3(%arg0: i32, %arg1: i32) -> (i32, i32, i32) {
    %c0_i32 = arith.constant 0 : i32
    %c0_i32_0 = arith.constant 0 : i32
    return %arg0, %c0_i32, %arg1 : i32, i32, i32
  }
}

</mosaic_0001>

<bundles_post_ra>
// kernel: channel_deconv.3
= control target key start
LH: loop header
LB: loop body
LE: loop exit
PB: predicated region body
PF: predicated region fallthrough
CT: control target
= control target key end

     0   :  { %s573_s12 = smov 0   ;;  %s575_s13 = smov 0   ;;  %s615_s0 = inlined_call_operand.vmem [shape: f32[4,4], index: 0, kind: input, shape index: {}]   ;;  %s616_s1 = inlined_call_operand.vmem [shape: f32[4,1], index: 1, kind: input, shape index: {}]   ;;  %s617_s2 = inlined_call_operand.vmem [shape: f32[2,4,512], index: 2, kind: input, shape index: {}]   ;;  %s618_s3 = inlined_call_operand.vmem [shape: f32[2,4,512], index: 3, kind: output, shape index: {}]  }
   0x1   :  { %s577_s14 = smov 0  }
   0x2 LB: > { %s25_s15 = sadd.s32 1, %s545_s13  ;;  %p483_p0 = scmp.ge.s32.totalorder %s549_s14, 1  ;;  %s549_s14 = sphi %s577_s14, %s13_s14   ;;  %s545_s13 = sphi %s575_s13, %s620_s13   ;;  %s541_s12 = sphi %s573_s12, %s619_s12  }
   0x3   : > { %p27_p1 = scmp.ge.s32.totalorder %s25_s15, 2  ;;  %p158_p2 = scmp.lt.s32.totalorder %s549_s14, 3 }
   0x5   : > { %s622_s15 = smov (%p27_p1, %s25_s15), 0  ;;  %p159_p3 = pnand %p483_p0, %p158_p2 }
   0x6   : > { %p191_p4 = scmp.lt.s32.totalorder (!%p159_p3), %s541_s12, 1  ;;  %v551_v0 = vmov (!%p159_p3), 0.0   ;;  %v372_v1 = vld [vmem:[%s616_s1] sm:$0xf] (!%p159_p3)  ;;  %v552_v2 = vmov (!%p159_p3), 0   ;;  %vm221_vm0 = vcmask (!%p159_p3), 1043456  }
   0x7   : > { %162 = sbr.rel (%p159_p3) target bundleno = 240 (0xf0), region = 32  ;;  %294 = vmatprep.mubr.f32.mxu0 (!%p159_p3), %v551_v0  ;;  %365 = vmatprep.mubr.f32.mxu1 (!%p159_p3), %v551_v0  ;;  %v210_v7 = vld [vmem:[%s615_s0] sm:$0xf] (!%p159_p3)  ;;  %vm217_vm1 = vcmask (!%p159_p3), 31744  }
   0x8   : > { %524 = vset.pattern.permute.xlu0 (!%p159_p3), %v552_v2 }
   0x9   : > { %375 = vperm.xlu0 (!%p159_p3), %524, %v372_v1  }
   0xe   : > { %s624_s12 = smov (!%p191_p4, %s541_s12), 1 }
   0xf   : > { %s496_s18 = sshll.u32 %s624_s12, 4 }
  0x10   : > { %s198_s21 = scalar_lea.vmem %s617_s2, %s496_s18  ;;  %s208_s26 = scalar_lea.vmem %s618_s3, %s496_s18 }
  0x11   : > { %v211_v3 = vld [vmem:[%s198_s21] sm:$0xff]  ;;  %v212_v4 = vld [vmem:[%s198_s21 + $0x8] sm:$0xff] }
  0x12   : > { %v215_v5 = vcombine.high %v211_v3, %v211_v3  ;;  %v216_v6 = vcombine.high %v212_v4, %v212_v4 }
  0x14   : > { %488 = vmatprep.subr.msk.mxu0 %vm221_vm0, %v215_v5  ;;  %491 = vmatprep.subr.msk.mxu1 %vm221_vm0, %v216_v6 }
  0x15   : > { %489 = vmatpush1.msk.msra.mxu0 %vm221_vm0, %v211_v3  ;;  %492 = vmatpush1.msk.msra.mxu1 %vm221_vm0, %v212_v4 }
  0x16   : > { %490 = vmatmul.mubr.msk.f32.vlgmr.msra.gmra.mrb[0].mxu0 %vm217_vm1, %v210_v7  ;;  %493 = vmatmul.mubr.msk.f32.vlgmr.msra.gmra.mrb[0].mxu1 %vm217_vm1, %v210_v7 }
  0x88   : > { %v376_v8 = vpop.permute.xlu0 %375 }
  0xe9   : > { %v296_v9 = vpop.f32.mrb[0].mxu0  ;;  %v367_v10 = vpop.f32.mrb[0].mxu1 }
  0xea   : > { %v378_v11 = vsub.f32 %v296_v9, %v376_v8  ;;  %v380_v12 = vsub.f32 %v367_v10, %v376_v8  ;;  %v298_v13 = vpop.f32.mrb[1].mxu0  ;;  %v369_v14 = vpop.f32.mrb[1].mxu1 }
  0xeb   : > { %v379_v15 = vsub.f32 %v298_v13, %v376_v8  ;;  %v381_v16 = vsub.f32 %v369_v14, %v376_v8 }
  0xed   : > { %v386_v17 = vcombine.low %v378_v11, %v379_v15  ;;  %v387_v18 = vcombine.low %v380_v12, %v381_v16 }
  0xef   : > { %390 = vst [vmem:[%s208_s26] sm:$0xff] %v386_v17  ;;  %391 = vst [vmem:[%s208_s26 + $0x8] sm:$0xff] %v387_v18 }
  0xf0 PF: > { %s13_s14 = sadd.s32 1, %s549_s14   ;;  %s619_s12 = smov %s545_s13 }
  0xf1   : > { %p10_p5 = scmp.ge.s32.totalorder %s13_s14, 4   ;;  %s620_s13 = smov %s622_s15 }
  0xf3   :  { %12 = sbr.rel (!%p10_p5) target bundleno = 2 (0x2), region = 62 }

// kernel: channel_deconv.2
= control target key start
LH: loop header
LB: loop body
LE: loop exit
PB: predicated region body
PF: predicated region fallthrough
CT: control target
= control target key end

     0   :  { %vm16_vm0 = vcmask 27648   ;;  %v1451_v0 = vmov 0.0   ;;  %vm1452_vm1 = vmmov 0   ;;  %v106_v2 = vlaneseq  ;;  %s1587_s0 = inlined_call_operand.vmem [shape: f32[4,128], index: 0, kind: input, shape index: {}]   ;;  %s1588_s1 = inlined_call_operand.vmem [shape: f32[4,4], index: 1, kind: output, shape index: {0}]   ;;  %s1589_s2 = inlined_call_operand.vmem [shape: f32[4,1], index: 2, kind: output, shape index: {1}]  }
   0x1   :  { %1359 = vmatprep.subr.mxu0 %v1451_v0  ;;  %v1472_v1 = vld [vmem:[%s1587_s0] sm:$0xf]  ;;  %1361 = vmatprep.mubr.msk.f32.mxu0 %vm1452_vm1, %v1451_v0  ;;  %17 = vst.msk [vmem:[#allocation3] sm:$0xf] %vm16_vm0, %v1451_v0  ;;  %vm20_vm3 = vcmask 1043456   ;;  %vm139_vm6 = vcmask 31744  }
   0x2   :  { %1360 = vmatpush3.xpose.msra.mxu0 %v1472_v1  ;;  %1364 = vmatprep.subr.mxu1 %v1451_v0  ;;  %v107_v4 = vshrl.u32 %v106_v2, 7  ;;  %v109_v5 = vand.u32 127, %v106_v2  ;;  %v21_v2 = vsel %vm20_vm3, %v1472_v1, 0.0  ;;  %vm14_vm7 = vcmask 3072  }
   0x3   :  { %1366 = vmatprep.mubr.msk.f32.mxu1 %vm1452_vm1, %v1451_v0  ;;  %1374 = vmatprep.subr.mxu0 %v1451_v0  ;;  %15 = vst.msk [vmem:[#allocation2] sm:$0xf] %vm14_vm7, %v1451_v0 }
   0x4   :  { %vm110_vm2 = vcmp.eq.s32.totalorder %v107_v4, %v109_v5 }
   0x5   :  { %1362 = vmatmul.mubr.f32.vlgmr.msra.gmra.mrb[0].mxu0 %v1472_v1  ;;  %v1296_v9 = vsel %vm110_vm2, 1.0, %v1451_v0 }
   0x6   :  { %1376 = vmatprep.mubr.msk.f32.mxu0 %vm1452_vm1, %v1451_v0  ;;  %v115_v10 = vmul.f32 0.01, %v1296_v9  ;;  %1375 = vmatpush3.msk.msra.mxu0 %vm20_vm3, %v1296_v9  ;;  %v1499_v31 = vmul.f32 1.5, %v1296_v9 }
   0x7   :  { %1384 = vmatprep.subr.mxu0 %v1451_v0 }
   0x8   :  { %v27_v3 = vld [vmem:[#allocation3] sm:$0xf] }
  0xd8   :  { %v94_v6 = vpop.f32.mrb[0].mxu0 }
  0xd9   :  { %v98_v7 = vadd.f32 %v94_v6, %v27_v3  ;;  %v1363_v8 = vpop.f32.mrb[1].mxu0 }
  0xdb   :  { %100 = vst.msk [vmem:[#allocation3] sm:$0xf] %vm16_vm0, %v98_v7  ;;  %v19_v7 = vld [vmem:[#allocation2] sm:$0xf] }
  0xe2   :  { %v113_v11 = vld [vmem:[#allocation3] sm:$0xf] }
  0xe3   :  { %v114_v12 = vmul.f32 0.00877193, %v113_v11 }
  0xe5   :  { %v116_v13 = vadd.f32 %v115_v10, %v114_v12 }
  0xe7   :  { %v117_v14 = vmul.f32 %v116_v13, %v116_v13 }
  0xe9   :  { %v118_v15 = vsel %vm16_vm0, %v117_v14, 0.0 }
  0xea   :  { %119 = vadd.xlane.f32.xlu0 %v118_v15 }
  0xee   :  { %22 = vadd.xlane.f32.xlu0 %v21_v2 }
 0x177   :  { %v120_v16 = vpop.xlane.xlu0 %119 }
 0x178   :  { %v121_v17 = vrot.slane %v120_v16, 4 }
 0x17a   :  { %v122_v18 = vadd.f32 %v121_v17, %v120_v16 }
 0x17b   :  { %v23_v8 = vpop.xlane.xlu0 %22 }
 0x17c   :  { %v123_v19 = vrot.slane %v122_v18, 2 }
 0x17e   :  { %v124_v20 = vadd.f32 %v123_v19, %v122_v18 }
 0x180   :  { %v125_v21 = vrot.slane %v124_v20, 1 }
 0x182   :  { %v126_v22 = vadd.f32 %v125_v21, %v124_v20 }
 0x184   :  { %1439 = vpush %v126_v22 }
 0x1b5   :  { %s1440_s0 = spop %1439 }
 0x1b6   :  { %v128_v23 = vstv %s1440_s0 }
 0x1b7   :  { %1443 = vrsqrt.f32 %v128_v23  ;;  %vm131_vm4 = vcmp.eq.f32.partialorder %v128_v23, inf  ;;  %v134_v26 = vand.u32 2147483648, %v128_v23  ;;  %vm133_vm5 = vcmp.eq.f32.partialorder %v128_v23, 0.0 }
 0x1c1   :  { %v1444_v24 = vpop.eup %1443 }
 0x1c2   :  { %v130_v25 = vmul.f32 %v1444_v24, %v128_v23 }
 0x1c4   :  { %v132_v27 = vsel %vm131_vm4, %v128_v23, %v130_v25 }
 0x1c5   :  { %v1491_v28 = vsel %vm133_vm5, %v134_v26, %v132_v27 }
 0x1c6   :  { %1445 = vrcp.f32 %v1491_v28  ;;  %vm1203_vm8 = vcmp.eq.f32.partialorder %v1491_v28, inf  ;;  %vm1205_vm9 = vcmp.eq.f32.partialorder %v1491_v28, 0.0 }
 0x1c7   :  { %1447 = vrsqrt.f32 %v1491_v28 }
 0x1d0   :  { %v1446_v29 = vpop.eup %1445 }
 0x1d1   :  { %v137_v30 = vmul.f32 %v1446_v29, %v116_v13  ;;  %v1448_v1 = vpop.eup %1447  ;;  %v1206_v13 = vand.u32 2147483648, %v1491_v28 }
 0x1d3   :  { %1365 = vmatpush3.msk.msra.mxu1 %vm20_vm3, %v137_v30 }
 0x1d4   :  { %1367 = vmatmul.mubr.msk.f32.vlgmr.msra.gmra.mrb[0].mxu1 %vm139_vm6, %v1296_v9  ;;  %1369 = vmatprep.subr.mxu1 %v1451_v0  ;;  %v24_v9 = vadd.f32 %v23_v8, %v19_v7 }
 0x1d5   :  { %1371 = vmatprep.mubr.msk.f32.mxu1 %vm1452_vm1, %v1451_v0 }
 0x1d6   :  { %26 = vst.msk [vmem:[#allocation2] sm:$0xf] %vm14_vm7, %v24_v9 }
 0x1dd   :  { %v104_v10 = vld [vmem:[#allocation2] sm:$0xf] }
 0x1de   :  { %v105_v11 = vmul.f32 0.00877193, %v104_v10 }
 0x2a7   :  { %v212_v32 = vpop.f32.mrb[0].mxu1 }
 0x2a8   :  { %v216_v33 = vmul.f32 0.5, %v212_v32  ;;  %v1368_v34 = vpop.f32.mrb[1].mxu1 }
 0x2aa   :  { %v217_v35 = vsub.f32 %v1499_v31, %v216_v33 }
 0x2ac   :  { %1370 = vmatpush3.msk.msra.mxu1 %vm20_vm3, %v217_v35  ;;  %1377 = vmatmul.mubr.msk.f32.vlgmr.msra.gmra.mrb[2].mxu0 %vm139_vm6, %v217_v35 }
 0x2ad   :  { %1372 = vmatmul.mubr.msk.f32.vlgmr.msra.gmra.mrb[2].mxu1 %vm139_vm6, %v137_v30  ;;  %1379 = vmatprep.subr.mxu1 %v1451_v0 }
 0x2ae   :  { %1381 = vmatprep.mubr.msk.f32.mxu1 %vm1452_vm1, %v1451_v0  ;;  %1386 = vmatprep.mubr.msk.f32.mxu0 %vm1452_vm1, %v1451_v0 }
 0x37f   :  { %v363_v36 = vpop.f32.mrb[2].mxu0 }
 0x380   :  { %v289_v37 = vpop.f32.mrb[2].mxu1  ;;  %v1378_v38 = vpop.f32.mrb[3].mxu0 }
 0x381   :  { %v1373_v39 = vpop.f32.mrb[3].mxu1  ;;  %1380 = vmatpush3.msk.msra.mxu1 %vm20_vm3, %v289_v37 }
 0x382   :  { %1382 = vmatmul.mubr.msk.f32.vlgmr.msra.gmra.mrb[4].mxu1 %vm139_vm6, %v363_v36  ;;  %1389 = vmatprep.subr.mxu1 %v1451_v0 }
 0x383   :  { %1390 = vmatpush3.msk.msra.mxu1 %vm20_vm3, %v363_v36  ;;  %1391 = vmatprep.mubr.msk.f32.mxu1 %vm1452_vm1, %v1451_v0 }
 0x384   :  { %1399 = vmatprep.subr.mxu1 %v1451_v0 }
 0x455   :  { %v439_v40 = vpop.f32.mrb[4].mxu1 }
 0x456   :  { %v443_v41 = vmul.f32 0.5, %v439_v40  ;;  %v1383_v42 = vpop.f32.mrb[5].mxu1 }
 0x458   :  { %v444_v43 = vsub.f32 %v1499_v31, %v443_v41 }
 0x45a   :  { %1385 = vmatpush3.msk.msra.mxu0 %vm20_vm3, %v444_v43  ;;  %1392 = vmatmul.mubr.msk.f32.vlgmr.msra.gmra.mrb[6].mxu1 %vm139_vm6, %v444_v43 }
 0x45b   :  { %1387 = vmatmul.mubr.msk.f32.vlgmr.msra.gmra.mrb[4].mxu0 %vm139_vm6, %v289_v37  ;;  %1394 = vmatprep.subr.mxu0 %v1451_v0 }
 0x45c   :  { %1396 = vmatprep.mubr.msk.f32.mxu0 %vm1452_vm1, %v1451_v0  ;;  %1401 = vmatprep.mubr.msk.f32.mxu1 %vm1452_vm1, %v1451_v0 }
 0x52d   :  { %v590_v44 = vpop.f32.mrb[6].mxu1 }
 0x52e   :  { %v516_v45 = vpop.f32.mrb[4].mxu0  ;;  %v1393_v46 = vpop.f32.mrb[7].mxu1 }
 0x52f   :  { %v1388_v47 = vpop.f32.mrb[5].mxu0  ;;  %1395 = vmatpush3.msk.msra.mxu0 %vm20_vm3, %v516_v45 }
 0x530   :  { %1397 = vmatmul.mubr.msk.f32.vlgmr.msra.gmra.mrb[6].mxu0 %vm139_vm6, %v590_v44  ;;  %1404 = vmatprep.subr.mxu0 %v1451_v0 }
 0x531   :  { %1405 = vmatpush3.msk.msra.mxu0 %vm20_vm3, %v590_v44  ;;  %1406 = vmatprep.mubr.msk.f32.mxu0 %vm1452_vm1, %v1451_v0 }
 0x532   :  { %1414 = vmatprep.subr.mxu0 %v1451_v0 }
 0x603   :  { %v666_v48 = vpop.f32.mrb[6].mxu0 }
 0x604   :  { %v670_v49 = vmul.f32 0.5, %v666_v48  ;;  %v1398_v50 = vpop.f32.mrb[7].mxu0 }
 0x606   :  { %v671_v51 = vsub.f32 %v1499_v31, %v670_v49 }
 0x608   :  { %1400 = vmatpush3.msk.msra.mxu1 %vm20_vm3, %v671_v51  ;;  %1407 = vmatmul.mubr.msk.f32.vlgmr.msra.gmra.mrb[8].mxu0 %vm139_vm6, %v671_v51 }
 0x609   :  { %1402 = vmatmul.mubr.msk.f32.vlgmr.msra.gmra.mrb[8].mxu1 %vm139_vm6, %v516_v45  ;;  %1409 = vmatprep.subr.mxu1 %v1451_v0 }
 0x60a   :  { %1411 = vmatprep.mubr.msk.f32.mxu1 %vm1452_vm1, %v1451_v0  ;;  %1416 = vmatprep.mubr.msk.f32.mxu0 %vm1452_vm1, %v1451_v0 }
 0x6db   :  { %v817_v52 = vpop.f32.mrb[8].mxu0 }
 0x6dc   :  { %v743_v53 = vpop.f32.mrb[8].mxu1  ;;  %v1408_v54 = vpop.f32.mrb[9].mxu0 }
 0x6dd   :  { %v1403_v55 = vpop.f32.mrb[9].mxu1  ;;  %1410 = vmatpush3.msk.msra.mxu1 %vm20_vm3, %v743_v53 }
 0x6de   :  { %1412 = vmatmul.mubr.msk.f32.vlgmr.msra.gmra.mrb[10].mxu1 %vm139_vm6, %v817_v52  ;;  %1419 = vmatprep.subr.mxu1 %v1451_v0 }
 0x6df   :  { %1420 = vmatpush3.msk.msra.mxu1 %vm20_vm3, %v817_v52  ;;  %1421 = vmatprep.mubr.msk.f32.mxu1 %vm1452_vm1, %v1451_v0 }
 0x6e0   :  { %1429 = vmatprep.subr.mxu1 %v1451_v0 }
 0x7b1   :  { %v893_v56 = vpop.f32.mrb[10].mxu1 }
 0x7b2   :  { %v897_v57 = vmul.f32 0.5, %v893_v56  ;;  %v1413_v58 = vpop.f32.mrb[11].mxu1 }
 0x7b4   :  { %v898_v59 = vsub.f32 %v1499_v31, %v897_v57 }
 0x7b6   :  { %1415 = vmatpush3.msk.msra.mxu0 %vm20_vm3, %v898_v59  ;;  %1422 = vmatmul.mubr.msk.f32.vlgmr.msra.gmra.mrb[12].mxu1 %vm139_vm6, %v898_v59 }
 0x7b7   :  { %1417 = vmatmul.mubr.msk.f32.vlgmr.msra.gmra.mrb[10].mxu0 %vm139_vm6, %v743_v53  ;;  %1424 = vmatprep.subr.mxu0 %v1451_v0 }
 0x7b8   :  { %1426 = vmatprep.mubr.msk.f32.mxu0 %vm1452_vm1, %v1451_v0  ;;  %1431 = vmatprep.mubr.msk.f32.mxu1 %vm1452_vm1, %v1451_v0 }
 0x889   :  { %v1044_v60 = vpop.f32.mrb[12].mxu1 }
 0x88a   :  { %v970_v61 = vpop.f32.mrb[10].mxu0  ;;  %v1423_v62 = vpop.f32.mrb[13].mxu1  ;;  %1430 = vmatpush3.msk.msra.mxu1 %vm20_vm3, %v1044_v60 }
 0x88b   :  { %v1418_v63 = vpop.f32.mrb[11].mxu0  ;;  %1425 = vmatpush3.msk.msra.mxu0 %vm20_vm3, %v970_v61 }
 0x88c   :  { %1427 = vmatmul.mubr.msk.f32.vlgmr.msra.gmra.mrb[12].mxu0 %vm139_vm6, %v1044_v60  ;;  %1434 = vmatprep.subr.mxu0 %v1451_v0 }
 0x88d   :  { %1436 = vmatprep.mubr.msk.f32.mxu0 %vm1452_vm1, %v1451_v0  ;;  %1435 = vmatpush3.msk.msra.mxu0 %vm20_vm3, %v105_v11  ;;  %v1202_v0 = vmul.f32 %v1448_v1, %v1491_v28 }
 0x88f   :  { %v1204_v12 = vsel %vm1203_vm8, %v1491_v28, %v1202_v0 }
 0x890   :  { %v1207_v14 = vsel %vm1205_vm9, %v1206_v13, %v1204_v12 }
 0x891   :  { %1449 = vrcp.f32 %v1207_v14 }
 0x89b   :  { %v1450_v15 = vpop.eup %1449 }
 0x95f   :  { %v1120_v3 = vpop.f32.mrb[12].mxu0 }
 0x960   :  { %v1124_v4 = vmul.f32 0.5, %v1120_v3  ;;  %v1428_v5 = vpop.f32.mrb[13].mxu0 }
 0x962   :  { %v1125_v6 = vsub.f32 %v1499_v31, %v1124_v4 }
 0x964   :  { %1432 = vmatmul.mubr.msk.f32.vlgmr.msra.gmra.mrb[14].mxu1 %vm139_vm6, %v1125_v6 }
 0xa37   :  { %v1197_v16 = vpop.f32.mrb[14].mxu1 }
 0xa38   :  { %v1209_v17 = vmul.f32 %v1450_v15, %v1197_v16  ;;  %v1433_v18 = vpop.f32.mrb[15].mxu1 }
 0xa3a   :  { %1210 = vst.msk [vmem:[%s1588_s1] sm:$0xf] %vm16_vm0, %v1209_v17  ;;  %1437 = vmatmul.mubr.msk.f32.vlgmr.msra.gmra.mrb[14].mxu0 %vm139_vm6, %v1209_v17 }
 0xb0d   :  { %v1283_v19 = vpop.f32.mrb[14].mxu0 }
 0xb0e   :  { %1287 = vst.msk [vmem:[%s1589_s2] sm:$0xf] %vm14_vm7, %v1283_v19  ;;  %v1438_v20 = vpop.f32.mrb[15].mxu0 }

</bundles_post_ra>
